<compile_context>
chip_gen: v7x
topology: tpu7x:2x2x1
jax: 0.10.0
libtpu: 0.0.40
codegen_flags: <defaults>
</compile_context>

<pallas_src>
import functools

import jax
import jax.numpy as jnp
from jax.experimental import pallas as pl
from jax.experimental.pallas import tpu as pltpu


_MAX_INFLIGHT_DMAS = 8   # 8 in-flight DMAs already saturate v5e HBM.


def _vmem_capacity_bytes():
    """Physical per-core VMEM; conservative fallback if the query is unavailable."""
    try:
        return int(pltpu.get_tpu_info().vmem_capacity_bytes)
    except Exception:
        return 64 << 20      # v7x per-TC physical VMEM (smallest of the three gens)


def _sublane(itemsize):
    # (8,128) tile for 4-byte, (16,128) for 2-byte, (32,128) for 1-byte dtypes.
    return max(8, 32 // int(itemsize))


# ---------------------------------------------------------------------------
# Path A: DMA-only HBM -> HBM cropped copy (lane-aligned, wide crops).
# ---------------------------------------------------------------------------
def _dma_crop_kernel(x_hbm, o_hbm, sems, *, offset, t_out, windows_per_step):
    """Each grid step issues its static set of strided HBM->HBM copies, keeps
    them all in flight, then waits.  Step assignment is static (pl.when on the
    grid index), so each step lowers to a handful of DMA descriptors."""
    pid = pl.program_id(0)
    for s, windows in enumerate(windows_per_step):          # static Python loop
        @pl.when(pid == s)
        def _(windows=windows, s=s):
            copies = []
            for k, (g0, gsz, r0, rsz) in enumerate(windows):
                copies.append(
                    pltpu.make_async_copy(
                        # crop folded into the DMA source address: cropped-away
                        # columns are never read from HBM.
                        x_hbm.at[pl.ds(g0, gsz), pl.ds(r0, rsz),
                                 pl.ds(offset, t_out)],
                        o_hbm.at[pl.ds(g0, gsz), pl.ds(r0, rsz),
                                 pl.ds(0, t_out)],
                        sems.at[s, k],
                    ))
            for cp in copies:        # start everything first ...
                cp.start()
            for cp in copies:        # ... then wait, so all DMAs overlap.
                cp.wait()


def _make_dma_windows(G, R, sublane, max_windows):
    """Static (g0, gsz, r0, rsz) windows covering the (G, R) row space.
    Prefer chunking along the major G axis (always tile-aligned); otherwise
    chunk along R at sublane-tile-aligned boundaries."""
    if G >= 2:
        n = min(max_windows, G)
        bounds = [g * G // n for g in range(n + 1)]
        return [(bounds[k], bounds[k + 1] - bounds[k], 0, R)
                for k in range(n) if bounds[k + 1] > bounds[k]]
    n_tiles = R // sublane
    if n_tiles >= 2:
        n = min(max_windows, n_tiles)
        starts = [(k * n_tiles // n) * sublane for k in range(n)] + [R]
        return [(0, G, starts[k], starts[k + 1] - starts[k])
                for k in range(n) if starts[k + 1] > starts[k]]
    return [(0, G, 0, R)]


def _crop3d_dma(x3, offset, t_out):
    G, R, t_in = x3.shape
    itemsize = jnp.dtype(x3.dtype).itemsize
    sublane = _sublane(itemsize)

    windows = _make_dma_windows(G, R, sublane, _MAX_INFLIGHT_DMAS)
    # Two "parallel" grid steps so v7x can split the copy across its two
    # TensorCores; on single-TC chips the grid simply iterates (negligible cost).
    n_steps = 2 if len(windows) >= 2 else 1
    per = (len(windows) + n_steps - 1) // n_steps
    windows_per_step = tuple(
        tuple(windows[s * per:(s + 1) * per]) for s in range(n_steps))
    max_per_step = max(len(w) for w in windows_per_step)

    kernel = functools.partial(
        _dma_crop_kernel, offset=offset, t_out=t_out,
        windows_per_step=windows_per_step)

    bytes_accessed = 2 * G * R * t_out * itemsize   # read window + write output

    return pl.pallas_call(
        kernel,
        out_shape=jax.ShapeDtypeStruct((G, R, t_out), x3.dtype),
        grid=(n_steps,),
        in_specs=[pl.BlockSpec(memory_space=pl.ANY)],   # raw HBM ref, no auto-DMA
        out_specs=pl.BlockSpec(memory_space=pl.ANY),    # written via DMA only
        scratch_shapes=[pltpu.SemaphoreType.DMA((n_steps, max_per_step))],
        compiler_params=pltpu.CompilerParams(
            dimension_semantics=("parallel",)),
        cost_estimate=pl.CostEstimate(
            flops=0, transcendentals=0, bytes_accessed=int(bytes_accessed)),
    )(x3)


# ---------------------------------------------------------------------------
# Path B: blocked-VMEM copy (unaligned or narrow crops), VMEM-budgeted tiles.
# ---------------------------------------------------------------------------
def _vmem_crop_kernel(x_ref, o_ref, *, offset, t_out):
    # In-register lane slice; output block is the full (row-tile, t_out) slab
    # so stores are as lane-dense as the output shape allows.
    o_ref[...] = x_ref[:, :, offset:offset + t_out]


def _crop3d_vmem(x3, offset, t_out):
    G, R, t_in = x3.shape
    itemsize = jnp.dtype(x3.dtype).itemsize
    sublane = _sublane(itemsize)

    # Budget the double-buffered (in + out) row tile against this chip's VMEM
    # (64 MiB physical on v7x, 128 MiB on v5e/v6e), instead of a flat 512.
    phys = _vmem_capacity_bytes()
    budget = (phys * 3) // 4
    per_row = 2 * (t_in + t_out) * itemsize          # double-buffered in+out rows
    cap = max(1, budget // max(per_row, 1))
    tile_r = min(R, 512, cap)                        # ~512 rows is the sweet spot
    if tile_r < R:
        tile_r = max(sublane, (tile_r // sublane) * sublane)
        tile_r = min(tile_r, R)

    needed = 2 * tile_r * (t_in + t_out) * itemsize + (2 << 20)
    vmem_limit = int(min(int(phys * 0.9), max(needed, 32 << 20)))

    kernel = functools.partial(_vmem_crop_kernel, offset=offset, t_out=t_out)
    bytes_accessed = G * R * (t_in + t_out) * itemsize

    return pl.pallas_call(
        kernel,
        out_shape=jax.ShapeDtypeStruct((G, R, t_out), x3.dtype),
        grid=(G, pl.cdiv(R, tile_r)),
        in_specs=[pl.BlockSpec((1, tile_r, t_in), lambda g, r: (g, r, 0))],
        out_specs=pl.BlockSpec((1, tile_r, t_out), lambda g, r: (g, r, 0)),
        compiler_params=pltpu.CompilerParams(
            dimension_semantics=("parallel", "parallel"),
            vmem_limit_bytes=vmem_limit),
        cost_estimate=pl.CostEstimate(
            flops=0, transcendentals=0, bytes_accessed=int(bytes_accessed)),
    )(x3)


# ---------------------------------------------------------------------------
# Public wrapper with Crop1d.forward semantics.
# ---------------------------------------------------------------------------
def crop1d(x, target, mode="both"):
    """Pallas implementation of Crop1d.forward(x, target)."""
    if x is None:
        return None
    if target is None:
        return x

    t_in = x.shape[-1]
    t_out = target.shape[-1]
    diff = t_in - t_out

    if mode == "both":
        assert diff % 2 == 0
        crop = diff // 2
    else:
        crop = diff

    if crop == 0:
        return x
    if crop < 0:
        raise ArithmeticError

    offset = 0 if mode == "back" else crop   # 'front'/'both' drop the first `crop`

    itemsize = jnp.dtype(x.dtype).itemsize
    sublane = _sublane(itemsize)

    # Canonical 3-D view (G, R, T): merge only the *major* leading dims, which
    # is a free metadata reshape (tiled minor-two dims untouched).
    if x.ndim >= 2:
        R = x.shape[-2]
        G = 1
        for d in x.shape[:-2]:
            G *= d
    else:
        G, R = 1, 1
    x3 = x.reshape(G, R, t_in)

    # Merge (G, R) only when provably a bitcast of the tiled HBM layout.
    if G > 1 and R % sublane == 0:
        x3 = x3.reshape(1, G * R, t_in)
        G, R = 1, G * R

    # Static, alignment-aware dispatch (no try/except: under an outer jit a
    # lowering failure would surface after crop1d returned, so a runtime
    # fallback can never trigger anyway).
    lane_aligned = (offset % 128 == 0) and (t_out % 128 == 0)
    wide_enough = t_out * itemsize >= 512            # ~one HBM burst per row
    if lane_aligned and wide_enough:
        out3 = _crop3d_dma(x3, offset, t_out)
    else:
        # TODO(synk): for very narrow t_out a lax.slice fused into the consumer
        # beats any standalone copy; kept as a Pallas kernel per spec.
        out3 = _crop3d_vmem(x3, offset, t_out)

    return out3.reshape(*x.shape[:-1], t_out)


if __name__ == "__main__":
    key = jax.random.PRNGKey(0)
    kx, kt, ka = jax.random.split(key, 3)

    ok = True

    # ---- small, unaligned shapes (VMEM path), matching the PyTorch module ----
    B, C, T_IN, T_OUT = 2, 4, 16, 12
    x = jax.random.normal(kx, (B, C, T_IN), dtype=jnp.float32)
    target = jax.random.normal(kt, (B, C, T_OUT), dtype=jnp.float32)

    out_both = jax.block_until_ready(crop1d(x, target, mode="both"))
    ok &= bool(jnp.array_equal(out_both, x[:, :, 2:-2]))
    ok &= out_both.shape == (B, C, T_OUT) and out_both.dtype == x.dtype

    out_front = jax.block_until_ready(crop1d(x, target, mode="front"))
    ok &= bool(jnp.array_equal(out_front, x[:, :, 4:]))

    out_back = jax.block_until_ready(crop1d(x, target, mode="back"))
    ok &= bool(jnp.array_equal(out_back, x[:, :, :-4]))

    xb = x.astype(jnp.bfloat16)
    out_bf16 = jax.block_until_ready(crop1d(xb, target, mode="both"))
    ok &= bool(jnp.array_equal(out_bf16, xb[:, :, 2:-2]))
    ok &= out_bf16.dtype == jnp.bfloat16

    # ---- lane-aligned, wide shapes (HBM->HBM DMA path) ----
    B2, C2, T2_IN, T2_OUT = 2, 8, 512, 256
    xa = jax.random.normal(ka, (B2, C2, T2_IN), dtype=jnp.float32)
    ta = jnp.zeros((B2, C2, T2_OUT), dtype=jnp.float32)

    out_a_both = jax.block_until_ready(crop1d(xa, ta, mode="both"))
    ok &= bool(jnp.array_equal(out_a_both, xa[:, :, 128:-128]))

    out_a_front = jax.block_until_ready(crop1d(xa, ta, mode="front"))
    ok &= bool(jnp.array_equal(out_a_front, xa[:, :, 256:]))

    out_a_back = jax.block_until_ready(crop1d(xa, ta, mode="back"))
    ok &= bool(jnp.array_equal(out_a_back, xa[:, :, :-256]))

    # 2-D input exercises the G==1, sublane-aligned R-chunking of the DMA path.
    x2 = xa.reshape(B2 * C2, T2_IN)
    t2 = ta.reshape(B2 * C2, T2_OUT)
    out_2d = jax.block_until_ready(crop1d(x2, t2, mode="both"))
    ok &= bool(jnp.array_equal(out_2d, x2[:, 128:-128]))

    # ---- passthrough semantics ----
    ok &= crop1d(None, target) is None
    ok &= crop1d(x, None) is x
    ok &= crop1d(x, x, mode="both") is x

    print("KERNEL_OK" if ok else "KERNEL_MISMATCH")
</pallas_src>

<mosaic_0001>
module attributes {stable_mosaic.version = 11 : i64} {
  func.func @_vmem_crop_kernel(%arg0: i32, %arg1: i32, %arg2: memref<1x4x16xf32, #tpu.memory_space<vmem>>, %arg3: memref<1x4x12xf32, #tpu.memory_space<vmem>>) attributes {dimension_semantics = [#tpu.dimension_semantics<parallel>, #tpu.dimension_semantics<parallel>], iteration_bounds = array<i64: 2, 1>, scalar_prefetch = 0 : i64, scratch_operands = 0 : i64, tpu.core_type = #tpu.core_type<tc>, window_params = [{transform_indices = @transform_0, window_bounds = array<i64: 1, 4, 16>}, {transform_indices = @transform_1, window_bounds = array<i64: 1, 4, 12>}]} {
    %c0 = arith.constant 0 : index
    %c0_0 = arith.constant 0 : index
    %c2 = arith.constant 2 : index
    %0 = vector.load %arg2[%c0, %c0_0, %c2] : memref<1x4x16xf32, #tpu.memory_space<vmem>>, vector<1x4x12xf32>
    %c0_1 = arith.constant 0 : index
    %c0_2 = arith.constant 0 : index
    %c0_3 = arith.constant 0 : index
    %1 = vector.load %arg3[%c0_1, %c0_2, %c0_3] : memref<1x4x12xf32, #tpu.memory_space<vmem>>, vector<1x4x12xf32>
    tpu.vector_store %arg3[%c0_1, %c0_2, %c0_3], %0 {strides = array<i32>} : memref<1x4x12xf32, #tpu.memory_space<vmem>>, vector<1x4x12xf32>,
    return
  }
  func.func @transform_0(%arg0: i32, %arg1: i32) -> (i32, i32, i32) {
    %c0_i32 = arith.constant 0 : i32
    %c0_i32_0 = arith.constant 0 : i32
    return %arg0, %arg1, %c0_i32 : i32, i32, i32
  }
  func.func @transform_1(%arg0: i32, %arg1: i32) -> (i32, i32, i32) {
    %c0_i32 = arith.constant 0 : i32
    %c0_i32_0 = arith.constant 0 : i32
    return %arg0, %arg1, %c0_i32 : i32, i32, i32
  }
}

</mosaic_0001>

<bundles_post_ra>
// kernel: tpu_custom_call.1
= control target key start
LH: loop header
LB: loop body
LE: loop exit
PB: predicated region body
PF: predicated region fallthrough
CT: control target
= control target key end

     0   :  { %6 = vsyncpa [#allocation3], 0  ;;  %s626_s0 = inlined_call_operand.hbm [shape: f32[2,4,16], index: 0, kind: input, shape index: {}]   ;;  %s627_s1 = inlined_call_operand.hbm [shape: f32[2,4,12], index: 1, kind: output, shape index: {}]  }
   0x1   :  { %8 = vsyncpa [#allocation3 + $0x1], 0 }
   0x2   :  { %9 = vsyncpa [#allocation4], 0 }
   0x3   :  { %11 = vsyncpa [#allocation4 + $0x1], 0  ;;  %s454_s6 = smov 0   ;;  %s456_s7 = smov 0  }
   0x4   :  { %s458_s8 = smov 0   ;;  %s460_s9 = smov 0  }
   0x5   :  { %s462_s10 = smov 0   ;;  %s464_s11 = smov 0  }
   0x6 LB: > { %s251_s12 = sadd.s32 4294967295, %s439_s11   ;;  %s252_s13 = sadd.s32 4294967294, %s439_s11   ;;  %s439_s11 = sphi %s464_s11, %s17_s11   ;;  %s435_s10 = sphi %s462_s10, %s643_s10   ;;  %s431_s9 = sphi %s460_s9, %s642_s9   ;;  %s427_s8 = sphi %s458_s8, %s641_s8   ;;  %s423_s7 = sphi %s456_s7, %s640_s7   ;;  %s419_s6 = sphi %s454_s6, %s639_s6  }
   0x7   : > { %s29_s14 = sadd.s32 1, %s435_s10  ;;  %s38_s15 = sadd.s32 1, %s427_s8 }
   0x8   : > { %p31_p0 = scmp.ge.s32.totalorder %s29_s14, 2  ;;  %p45_p1 = scmp.ne.s32.totalorder %s427_s8, %s423_s7 }
   0x9   : > { %p46_p2 = scmp.eq.s32.totalorder %s439_s11, 0  ;;  %p51_p3 = scmp.ne.s32.totalorder %s423_s7, %s419_s6 }
   0xa   : > { %s645_s14 = smov (%p31_p0, %s29_s14), 0  ;;  %p52_p5 = scmp.eq.s32.totalorder %s251_s12, 0 }
   0xb   : > { %p495_p4 = por %p46_p2, %p45_p1  ;;  %s33_s17 = ssub.s32 %s435_s10, %s645_s14 }
   0xc   : > { %p77_p6 = scmp.eq.s32.totalorder %s251_s12, 1  ;;  %p36_p7 = scmp.eq.s32.totalorder %s33_s17, 0 }
   0xd   : > { %p501_p8 = por %p52_p5, %p51_p3  ;;  %p83_p10 = scmp.eq.s32.totalorder %s252_s13, 1 }
   0xe   : > { %p505_p9 = por %p77_p6, %p45_p1  ;;  %p276_p13 = scmp.lt.s32.totalorder %s439_s11, 2 }
   0xf   : > { %s510_s20 = scalar_select %p36_p7, %s427_s8, %s38_s15  }
  0x10   : > { %s631_s19 = scalar_select %p505_p9, 1, 0 }
  0x11   : > { %p512_p11 = por %p83_p10, %p51_p3  ;;  %s103_s22 = sand.u32 1, %s427_s8  }
  0x12   : > { %s255_s23 = sshll.u32 %s103_s22, 2  ;;  %s256_s24 = sshll.u32 %s435_s10, 6 }
  0x13   : > { %s632_s21 = scalar_select %p512_p11, 1, 0 }
  0x14   : > { %s523_s27 = scalar_lea.hbm %s626_s0, %s256_s24  ;;  %s107_s28 = scalar_lea.vmem [#allocation2], %s255_s23 }
  0x15   : > { %s115_s29 = sshll.u32 %s107_s28, 4  ;;  %p529_p0 = pnand %p276_p13, %p495_p4  ;;  %s525_s29 = int_to_ptr.vmem [resolvable:$true] %s115_s29 }
  0x16   : > { %s104_s2 = scalar_lea.sflag [#allocation3], %s103_s22  ;;  %s327_s3 = scalar_lea.hbm %s523_s27, 64 }
  0x17   : > { %p328_p3 = scmp.ne.s32.totalorder %s523_s27, %s327_s3  ;;  %p329_p5 = pneg %p529_p0 }
  0x18   : > { %s332_s12 = scalar_lea.hbm %s626_s0, 128  ;;  %p333_p4 = scmp.lt.u32.totalorder %s523_s27, %s626_s0 }
  0x19   : > { %p330_p6 = pnand %p329_p5, %p328_p3  ;;  %p334_p10 = scmp.lt.u32.totalorder %s332_s12, %s327_s3 }
  0x1a   : > { %p336_p12 = scmp.lt.u32.totalorder %s327_s3, %s523_s27 }
  0x1b   : > { %p331_p7 = pneg %p330_p6  ;;  %p335_p13 = por %p334_p10, %p333_p4 }
  0x1d   : > { %p337_p1 = por %p336_p12, %p335_p13 }
  0x1f   : > { %p338_p2 = pnand %p337_p1, %p331_p7 }
  0x21   : > { %341 = shalt.err (!%p338_p2)
}
  0x22   : > { %s342_s16 = scalar_lea.vmem %s525_s29, 64  ;;  %s441_s17 = smov [#allocation2]  }
  0x23   : > { %p343_p3 = scmp.ne.s32.totalorder %s525_s29, %s342_s16  ;;  %s347_s22 = sshll.u32 %s441_s17, 4  ;;  %s348_s22 = int_to_ptr.vmem [resolvable:$false] %s347_s22 }
  0x24   : > { %s349_s23 = scalar_lea.vmem %s348_s22, 128  ;;  %p350_p9 = scmp.lt.s32.totalorder %s525_s29, %s348_s22 }
  0x25   : > { %p345_p6 = pnand %p343_p3, %p329_p5  ;;  %p351_p4 = scmp.lt.s32.totalorder %s349_s23, %s342_s16 }
  0x27   : > { %p346_p11 = pneg %p345_p6  ;;  %p352_p10 = por %p351_p4, %p350_p9 }
  0x29   : > { %p353_p12 = pnand %p352_p10, %p346_p11 }
  0x2b   : > { %356 = shalt.err (!%p353_p12)
}
  0x2c   : > { %271 = dma.hbm_to_vmem [thread:$0]  (!%p529_p0), %s523_s27, 64, %s525_s29, %s104_s2  }
  0x2d   : > { %p634_p1 = scmp.lt.s32.totalorder %s439_s11, 3  ;;  %p635_p2 = scmp.ge.s32.totalorder %s439_s11, 1 }
  0x2f   : > { %p121_p5 = pnand %p635_p2, %p634_p1 }
  0x30   : > { %s565_s24 = sand.u32 (!%p121_p5), 1, %s423_s7  }
  0x31   : > { %124 = sbr.rel (%p121_p5) target bundleno = 187 (0xbb), region = 24  ;;  %s258_s25 = sshll.u32 (!%p121_p5), %s565_s24, 2 }
  0x32   : > { %s127_s26 = scalar_lea.sflag (!%p121_p5), [#allocation3], %s565_s24  ;;  %s130_s28 = scalar_lea.vmem (!%p121_p5), [#allocation2], %s258_s25 }
  0x38   : > { %410 = dma.done.wait (%p501_p8), %s127_s26, 64  }
  0x39   : > { %412 = vsyncadd (%p501_p8), %s127_s26, 4294967232  ;;  %v149_v0 = vld [vmem:[%s130_s28] sm:$0xf]  ;;  %s442_s27 = smov 126   ;;  %s261_s29 = sshll.u32 %s431_s9, 6  ;;  %vm154_vm0 = vcmask 93184  }
  0x3a   : > { %151 = vrot.lane.b32.xlu0 %v149_v0, %s442_s27  ;;  %s148_s30 = scalar_lea.vmem [#allocation5], %s258_s25  ;;  %s577_s5 = scalar_lea.hbm %s627_s1, %s261_s29 }
  0x3b   : > { %s171_s2 = sshll.u32 %s148_s30, 4  ;;  %s157_s18 = scalar_lea.sflag [#allocation4], %s565_s24  ;;  %s579_s2 = int_to_ptr.vmem [resolvable:$true] %s171_s2 }
  0x3c   : > { %s357_s12 = scalar_lea.vmem %s579_s2, 64  ;;  %p636_p9 = scmp.ne.s32.totalorder %s631_s19, 0 }
  0x3d   : > { %p358_p8 = scmp.ne.s32.totalorder %s579_s2, %s357_s12  ;;  %s443_s9 = smov [#allocation5]  }
  0x3e   : > { %s361_s13 = sshll.u32 %s443_s9, 4  ;;  %s362_s13 = int_to_ptr.vmem [resolvable:$false] %s361_s13 }
  0x3f   : > { %p359_p11 = pnand %p358_p8, %p636_p9  ;;  %s363_s15 = scalar_lea.vmem %s362_s13, 128 }
  0x40   : > { %p364_p7 = scmp.lt.s32.totalorder %s579_s2, %s362_s13  ;;  %p365_p13 = scmp.lt.s32.totalorder %s363_s15, %s357_s12 }
  0x41   : > { %p360_p0 = pneg %p359_p11 }
  0x42   : > { %p366_p3 = por %p365_p13, %p364_p7 }
  0x44   : > { %p367_p6 = pnand %p366_p3, %p360_p0 }
  0xac   : > { %v152_v1 = vpop.permute.xlu0 %151 }
  0xad   : > { %155 = vst.msk [vmem:[%s148_s30] sm:$0xf] %vm154_vm0, %v152_v1 }
  0xae   : > { %370 = shalt.err (!%p367_p6)
}
  0xaf   : > { %s371_s16 = scalar_lea.hbm %s577_s5, 64  ;;  %s375_s23 = scalar_lea.hbm %s627_s1, 128 }
  0xb0   : > { %p372_p4 = scmp.ne.s32.totalorder %s577_s5, %s371_s16  ;;  %p376_p1 = scmp.lt.u32.totalorder %s577_s5, %s627_s1 }
  0xb1   : > { %p377_p2 = scmp.lt.u32.totalorder %s375_s23, %s371_s16  ;;  %p379_p8 = scmp.lt.u32.totalorder %s371_s16, %s577_s5 }
  0xb2   : > { %p373_p10 = pnand %p372_p4, %p636_p9 }
  0xb3   : > { %p378_p5 = por %p377_p2, %p376_p1 }
  0xb4   : > { %p374_p12 = pneg %p373_p10 }
  0xb5   : > { %p380_p11 = por %p379_p8, %p378_p5 }
  0xb7   : > { %p381_p0 = pnand %p380_p11, %p374_p12 }
  0xb9   : > { %384 = shalt.err (!%p381_p0)
}
  0xba   : > { %266 = dma.vmem_to_hbm [thread:$0]  (%p636_p9), %s579_s2, 64, %s577_s5, %s157_s18  }
  0xbb PF: > { %s183_s26 = sand.u32 1, %s419_s6   ;;  %p637_p7 = scmp.ne.s32.totalorder %s632_s21, 0 }
  0xbc   : > { %p638_p13 = scmp.ge.s32.totalorder %s439_s11, 2  ;;  %s184_s28 = scalar_lea.sflag [#allocation4], %s183_s26 }
  0xbe   : > { %p273_p3 = pnand %p638_p13, %p637_p7 }
  0xc0   : > { %414 = dma.done.wait (!%p273_p3), %s184_s28, 64  }
  0xc1   : > { %416 = vsyncadd (!%p273_p3), %s184_s28, 4294967232  ;;  %s17_s11 = sadd.s32 1, %s439_s11   ;;  %s639_s6 = smov %s423_s7 }
  0xc2   : > { %p14_p6 = scmp.ge.s32.totalorder %s17_s11, 4   ;;  %s640_s7 = smov %s427_s8 }
  0xc3   : > { %s641_s8 = smov %s510_s20  ;;  %s642_s9 = smov %s435_s10 }
  0xc4   : > { %s643_s10 = smov %s645_s14  ;;  %16 = sbr.rel (!%p14_p6) target bundleno = 6 (0x6), region = 69 }
  0xcb   :  { %189 = vsyncpa [#allocation3], 1 }
  0xcc   :  { %191 = vsyncpa [#allocation3 + $0x1], 1 }
  0xcd   :  { %192 = vsyncpa [#allocation4], 1 }
  0xce   :  { %194 = vsyncpa [#allocation4 + $0x1], 1 }

</bundles_post_ra>
